<compile_context>
chip_gen: v5e
topology: v5e:2x2
jax: 0.10.0
libtpu: 0.0.40
codegen_flags: <defaults>
</compile_context>

<pallas_src>
import jax
import jax.numpy as jnp
from jax import lax
from jax.experimental import pallas as pl
from jax.experimental.pallas import tpu as pltpu


def _conv_stats_kernel(p_ref, w_ref, y_ref, sum_ref, sq_ref):
    # [tm, K](bf16) @ [K, CP](bf16) -> [tm, CP] f32 on the MXU.
    y = jnp.dot(p_ref[...], w_ref[...], preferred_element_type=jnp.float32)
    y_ref[...] = y

    # Per-block partial channel statistics, folded to an (8, CP) tile so every
    # store is a full (8,128) vreg tile (no masked 1-row read-modify-write) and
    # no grid-resident accumulator is needed (M axis stays "parallel").
    tm, cp = y.shape
    y3 = y.reshape(tm // 8, 8, cp)
    sum_ref[...] = jnp.sum(y3, axis=0)
    sq_ref[...] = jnp.sum(y3 * y3, axis=0)


def _bn_lrelu_kernel(y_ref, scale_ref, shift_ref, o_ref):
    y = y_ref[...] * scale_ref[...] + shift_ref[...]
    o_ref[...] = jnp.where(y >= 0.0, y, 0.1 * y)


def convlayer_forward(x_nchw, w_oihw, b, gamma, beta, *, stride, padding,
                      eps=1e-5, tm=512):
    del b  # conv bias cancels exactly under training-mode BatchNorm
    N, Cin, H, W = x_nchw.shape
    Cout, _, kh, kw = w_oihw.shape
    OH = (H + 2 * padding - kh) // stride + 1
    OW = (W + 2 * padding - kw) // stride + 1

    M = N * OH * OW
    K = kh * kw * Cin
    CP = ((Cout + 127) // 128) * 128          # lane-dense padded channel dim
    assert tm % 8 == 0
    M_pad = ((M + tm - 1) // tm) * tm
    nb = M_pad // tm

    # ---- glue: im2col patch extraction (NCHW -> NHWC -> [M_pad, K]) ----
    x = jnp.transpose(x_nchw, (0, 2, 3, 1)).astype(jnp.float32)
    xp = jnp.pad(x, ((0, 0), (padding, padding), (padding, padding), (0, 0)))
    cols = []
    for dh in range(kh):
        for dw in range(kw):
            cols.append(xp[:, dh:dh + stride * OH:stride,
                           dw:dw + stride * OW:stride, :])
    patches = jnp.concatenate(cols, axis=-1).reshape(M, K)
    patches = jnp.pad(patches, ((0, M_pad - M), (0, 0))).astype(jnp.bfloat16)

    # PyTorch weight (Cout, Cin, kh, kw) -> (kh, kw, Cin, Cout) -> [K, CP]
    wmat = jnp.transpose(w_oihw, (2, 3, 1, 0)).reshape(K, Cout)
    wmat = jnp.pad(wmat, ((0, 0), (0, CP - Cout))).astype(jnp.bfloat16)

    # ---- Pallas kernel 1: conv matmul + per-block partial channel stats ----
    conv_out, psum, psq = pl.pallas_call(
        _conv_stats_kernel,
        out_shape=(jax.ShapeDtypeStruct((M_pad, CP), jnp.float32),
                   jax.ShapeDtypeStruct((nb * 8, CP), jnp.float32),
                   jax.ShapeDtypeStruct((nb * 8, CP), jnp.float32)),
        grid_spec=pltpu.PrefetchScalarGridSpec(
            num_scalar_prefetch=0,
            grid=(nb,),
            in_specs=[pl.BlockSpec((tm, K), lambda i: (i, 0)),
                      pl.BlockSpec((K, CP), lambda i: (0, 0))],
            out_specs=[pl.BlockSpec((tm, CP), lambda i: (i, 0)),
                       pl.BlockSpec((8, CP), lambda i: (i, 0)),
                       pl.BlockSpec((8, CP), lambda i: (i, 0))]),
        compiler_params=pltpu.CompilerParams(
            dimension_semantics=("parallel",)),
    )(patches, wmat)

    # ---- glue: reduce partial stats, fold into per-channel scale/shift ----
    # Zero-padded rows (no bias) contribute exactly 0 to both sums, so we just
    # divide by the true element count M.
    total = jnp.sum(psum, axis=0)                       # (CP,)
    total_sq = jnp.sum(psq, axis=0)                     # (CP,)
    mean = total / M
    var = jnp.maximum(total_sq / M - mean * mean, 0.0)  # biased var (BN training)

    gamma_p = jnp.pad(gamma.astype(jnp.float32), (0, CP - Cout))
    beta_p = jnp.pad(beta.astype(jnp.float32), (0, CP - Cout))
    scale = (gamma_p / jnp.sqrt(var + eps)).reshape(1, CP)
    shift = (beta_p - mean * scale[0]).reshape(1, CP)

    # ---- Pallas kernel 2: fused BN affine + LeakyReLU(0.1), in place ----
    out = pl.pallas_call(
        _bn_lrelu_kernel,
        out_shape=jax.ShapeDtypeStruct((M_pad, CP), jnp.float32),
        grid_spec=pltpu.PrefetchScalarGridSpec(
            num_scalar_prefetch=0,
            grid=(nb,),
            in_specs=[pl.BlockSpec((tm, CP), lambda i: (i, 0)),
                      pl.BlockSpec((1, CP), lambda i: (0, 0)),
                      pl.BlockSpec((1, CP), lambda i: (0, 0))],
            out_specs=pl.BlockSpec((tm, CP), lambda i: (i, 0))),
        compiler_params=pltpu.CompilerParams(
            dimension_semantics=("parallel",)),
        input_output_aliases={0: 0},
    )(conv_out, scale, shift)

    # strip padding, back to PyTorch NCHW
    out = out[:M, :Cout].reshape(N, OH, OW, Cout)
    return jnp.transpose(out, (0, 3, 1, 2))


def _reference(x, w, b, gamma, beta, *, stride, padding, eps=1e-5):
    y = lax.conv_general_dilated(
        x, w, (stride, stride), [(padding, padding)] * 2,
        dimension_numbers=("NCHW", "OIHW", "NCHW"))
    y = y + b.reshape(1, -1, 1, 1)
    mean = jnp.mean(y, axis=(0, 2, 3), keepdims=True)
    var = jnp.var(y, axis=(0, 2, 3), keepdims=True)
    y = (y - mean) / jnp.sqrt(var + eps)
    y = gamma.reshape(1, -1, 1, 1) * y + beta.reshape(1, -1, 1, 1)
    return jnp.where(y >= 0, y, 0.1 * y)


if __name__ == "__main__":
    # Convlayer(input_channels=4, output_channels=8, kernel_size=3, stride=1, padding=1)
    N, Cin, H, W = 2, 4, 16, 16
    Cout, kh, kw = 8, 3, 3
    stride, padding = 1, 1

    key = jax.random.PRNGKey(0)
    kx, kw_, kb, kg, kbeta = jax.random.split(key, 5)
    x = jax.random.normal(kx, (N, Cin, H, W), dtype=jnp.float32)
    w = 0.1 * jax.random.normal(kw_, (Cout, Cin, kh, kw), dtype=jnp.float32)
    b = 0.1 * jax.random.normal(kb, (Cout,), dtype=jnp.float32)
    gamma = 1.0 + 0.1 * jax.random.normal(kg, (Cout,), dtype=jnp.float32)
    beta = 0.1 * jax.random.normal(kbeta, (Cout,), dtype=jnp.float32)

    out = convlayer_forward(x, w, b, gamma, beta, stride=stride, padding=padding)
    out = jax.block_until_ready(out)

    ref = _reference(x, w, b, gamma, beta, stride=stride, padding=padding)
    assert out.shape == ref.shape == (N, Cout, H, W)
    # tolerance accounts for bf16 matmul inputs (f32 accumulation)
    assert jnp.allclose(out, ref, atol=2e-2, rtol=2e-2)
    print("KERNEL_OK")
</pallas_src>

<mosaic_0001>
module attributes {stable_mosaic.version = 11 : i64} {
  func.func @_conv_stats_kernel(%arg0: i32, %arg1: memref<512x36xbf16, #tpu.memory_space<vmem>>, %arg2: memref<36x128xbf16, #tpu.memory_space<vmem>>, %arg3: memref<512x128xf32, #tpu.memory_space<vmem>>, %arg4: memref<8x128xf32, #tpu.memory_space<vmem>>, %arg5: memref<8x128xf32, #tpu.memory_space<vmem>>) attributes {dimension_semantics = [#tpu.dimension_semantics<parallel>], iteration_bounds = array<i64: 1>, scalar_prefetch = 0 : i64, scratch_operands = 0 : i64, tpu.core_type = #tpu.core_type<tc>, window_params = [{transform_indices = @transform_0, window_bounds = array<i64: 512, 36>}, {pipeline_mode = #tpu.pipeline_mode<synchronous>, transform_indices = @transform_1, window_bounds = array<i64: 36, 128>}, {transform_indices = @transform_2, window_bounds = array<i64: 512, 128>}, {transform_indices = @transform_3, window_bounds = array<i64: 8, 128>}, {transform_indices = @transform_4, window_bounds = array<i64: 8, 128>}]} {
    %c0 = arith.constant 0 : index
    %c0_0 = arith.constant 0 : index
    %0 = vector.load %arg1[%c0, %c0_0] : memref<512x36xbf16, #tpu.memory_space<vmem>>, vector<512x36xbf16>
    %c0_1 = arith.constant 0 : index
    %c0_2 = arith.constant 0 : index
    %1 = vector.load %arg2[%c0_1, %c0_2] : memref<36x128xbf16, #tpu.memory_space<vmem>>, vector<36x128xbf16>
    %cst = arith.constant dense<0.000000e+00> : vector<512x128xf32>
    %2 = tpu.matmul %0, %1, %cst {dimension_numbers = #tpu.dot_dimension_numbers<[1], [0], [0], [1], [0, 0, 1, 1], [], []>} : vector<512x36xbf16>, vector<36x128xbf16>, vector<512x128xf32> -> vector<512x128xf32>
    %c0_3 = arith.constant 0 : index
    %c0_4 = arith.constant 0 : index
    %3 = vector.load %arg3[%c0_3, %c0_4] : memref<512x128xf32, #tpu.memory_space<vmem>>, vector<512x128xf32>
    tpu.vector_store %arg3[%c0_3, %c0_4], %2 {strides = array<i32>} : memref<512x128xf32, #tpu.memory_space<vmem>>, vector<512x128xf32>,
    %4 = vector.shape_cast %2 : vector<512x128xf32> to vector<64x8x128xf32>
    %cst_5 = arith.constant dense<0.000000e+00> : vector<8x128xf32>
    %5 = vector.multi_reduction <add>, %4, %cst_5 [0] : vector<64x8x128xf32> to vector<8x128xf32>
    %c0_6 = arith.constant 0 : index
    %c0_7 = arith.constant 0 : index
    %6 = vector.load %arg4[%c0_6, %c0_7] : memref<8x128xf32, #tpu.memory_space<vmem>>, vector<8x128xf32>
    tpu.vector_store %arg4[%c0_6, %c0_7], %5 {strides = array<i32>} : memref<8x128xf32, #tpu.memory_space<vmem>>, vector<8x128xf32>,
    %7 = arith.mulf %4, %4 : vector<64x8x128xf32>
    %cst_8 = arith.constant dense<0.000000e+00> : vector<8x128xf32>
    %8 = vector.multi_reduction <add>, %7, %cst_8 [0] : vector<64x8x128xf32> to vector<8x128xf32>
    %c0_9 = arith.constant 0 : index
    %c0_10 = arith.constant 0 : index
    %9 = vector.load %arg5[%c0_9, %c0_10] : memref<8x128xf32, #tpu.memory_space<vmem>>, vector<8x128xf32>
    tpu.vector_store %arg5[%c0_9, %c0_10], %8 {strides = array<i32>} : memref<8x128xf32, #tpu.memory_space<vmem>>, vector<8x128xf32>,
    return
  }
  func.func @transform_0(%arg0: i32) -> (i32, i32) {
    %c0_i32 = arith.constant 0 : i32
    %c0_i32_0 = arith.constant 0 : i32
    return %arg0, %c0_i32 : i32, i32
  }
  func.func @transform_1(%arg0: i32) -> (i32, i32) {
    %c0_i32 = arith.constant 0 : i32
    %c0_i32_0 = arith.constant 0 : i32
    %c0_i32_1 = arith.constant 0 : i32
    return %c0_i32, %c0_i32_0 : i32, i32
  }
  func.func @transform_2(%arg0: i32) -> (i32, i32) {
    %c0_i32 = arith.constant 0 : i32
    %c0_i32_0 = arith.constant 0 : i32
    return %arg0, %c0_i32 : i32, i32
  }
  func.func @transform_3(%arg0: i32) -> (i32, i32) {
    %c0_i32 = arith.constant 0 : i32
    %c0_i32_0 = arith.constant 0 : i32
    return %arg0, %c0_i32 : i32, i32
  }
  func.func @transform_4(%arg0: i32) -> (i32, i32) {
    %c0_i32 = arith.constant 0 : i32
    %c0_i32_0 = arith.constant 0 : i32
    return %arg0, %c0_i32 : i32, i32
  }
}

</mosaic_0001>

<bundles_post_ra>
// kernel: tpu_custom_call.1
= control target key start
LH: loop header
LB: loop body
LE: loop exit
PB: predicated region body
PF: predicated region fallthrough
CT: control target
= control target key end

     0   :  { %10 = vsyncpa [#allocation3], 0  ;;  %vm358_vm0 = vcmask 1041408   ;;  %s1598_s0 = inlined_call_operand.vmem [shape: bf16[512,36], index: 0, kind: input, shape index: {}]   ;;  %s1599_s1 = inlined_call_operand.vmem [shape: bf16[36,128], index: 1, kind: input, shape index: {}]   ;;  %s1600_s2 = inlined_call_operand.hbm [shape: f32[512,128], index: 2, kind: output, shape index: {0}]   ;;  %s1601_s3 = inlined_call_operand.hbm [shape: f32[8,128], index: 3, kind: output, shape index: {1}]   ;;  %s1602_s4 = inlined_call_operand.hbm [shape: f32[8,128], index: 4, kind: output, shape index: {2}]  }
   0x1   :  { %v85_v0 = vld [vmem:[%s1599_s1 + $0x10] sm:$0x3] }
   0x2   :  { %v255_v1 = vunpack.c.l.b16 %v85_v0 }
   0x3   :  { %11 = vsyncpa [#allocation5], 0  ;;  %v1037_v4 = vld [vmem:[%s1599_s1 + $0x8] sm:$0xff]  ;;  %v1036_v5 = vld [vmem:[%s1599_s1] sm:$0xff]  ;;  %vm261_vm1 = vcmask 293888   ;;  %s793_s7 = sshll.u32 %s1600_s2, 4  ;;  %s794_s7 = int_to_ptr.hbm [resolvable:$true] %s793_s7 }
   0x4   :  { %v258_v2 = vpack.c.b16 %v255_v1, %v255_v1  ;;  %v1004_v6 = vld [vmem:[%s1598_s0] sm:$0xff]  ;;  %v1005_v8 = vld [vmem:[%s1598_s0 + $0x8] sm:$0xff]  ;;  %v1006_v11 = vld [vmem:[%s1598_s0 + $0x10] sm:$0xff]  ;;  %s1129_s2 = smov 128   ;;  %s1130_s8 = smov 8  }
   0x5   :  { %v1012_v7 = vld [vmem:[%s1598_s0 + $0x40] sm:$0xff]  ;;  %v1013_v9 = vld [vmem:[%s1598_s0 + $0x48] sm:$0xff]  ;;  %v1014_v12 = vld [vmem:[%s1598_s0 + $0x50] sm:$0xff]  ;;  %s1131_s9 = smov [#allocation4]   ;;  %s807_s13 = sshll.u32 %s1601_s3, 4  ;;  %s808_s13 = int_to_ptr.hbm [resolvable:$true] %s807_s13 }
   0x6   :  { %v360_v3 = vsel %vm358_vm0, %v258_v2, 0  ;;  %v1020_v10 = vld [vmem:[%s1598_s0 + $0x80] sm:$0xff]  ;;  %v1021_v13 = vld [vmem:[%s1598_s0 + $0x88] sm:$0xff]  ;;  %v1007_v14 = vld [vmem:[%s1598_s0 + $0x18] sm:$0xff]  ;;  %s805_s10 = sshll.u32 %s1131_s9, 4  ;;  %s1132_s14 = smov [#allocation6]   ;;  %s806_s10 = int_to_ptr.vmem [resolvable:$true] %s805_s10 }
   0x7   :  { %367 = vmatpush.bf16.msra.mxu0 %v360_v3  ;;  %1038 = vmatpush.bf16.msra.mxu1 %v360_v3  ;;  %v1015_v15 = vld [vmem:[%s1598_s0 + $0x58] sm:$0xff]  ;;  %v1022_v16 = vld [vmem:[%s1598_s0 + $0x90] sm:$0xff]  ;;  %v1028_v17 = vld [vmem:[%s1598_s0 + $0xc0] sm:$0xff]  ;;  %s816_s15 = sshll.u32 %s1132_s14, 4  ;;  %s818_s18 = sshll.u32 %s1602_s4, 4  ;;  %s817_s15 = int_to_ptr.vmem [resolvable:$true] %s816_s15  ;;  %s819_s18 = int_to_ptr.hbm [resolvable:$true] %s818_s18 }
   0x8   :  { %1039 = vmatpush.bf16.msra.mxu2 %v360_v3  ;;  %1040 = vmatpush.bf16.msra.mxu3 %v360_v3  ;;  %v1008_v18 = vld [vmem:[%s1598_s0 + $0x20] sm:$0xff]  ;;  %v1023_v20 = vld [vmem:[%s1598_s0 + $0x98] sm:$0xff]  ;;  %v1029_v21 = vld [vmem:[%s1598_s0 + $0xc8] sm:$0xff] }
   0x9   :  { %v1016_v19 = vld [vmem:[%s1598_s0 + $0x60] sm:$0xff]  ;;  %v1009_v22 = vld [vmem:[%s1598_s0 + $0x28] sm:$0xff]  ;;  %v1030_v25 = vld [vmem:[%s1598_s0 + $0xd0] sm:$0xff] }
   0xa   :  { %v1017_v23 = vld [vmem:[%s1598_s0 + $0x68] sm:$0xff]  ;;  %v1024_v24 = vld [vmem:[%s1598_s0 + $0xa0] sm:$0xff]  ;;  %v1010_v26 = vld [vmem:[%s1598_s0 + $0x30] sm:$0xff] }
   0xb   :  { %368 = vmatpush.bf16.msra.mxu0 %v1037_v4  ;;  %1041 = vmatpush.bf16.msra.mxu1 %v1037_v4  ;;  %v1018_v27 = vld [vmem:[%s1598_s0 + $0x70] sm:$0xff]  ;;  %v1025_v28 = vld [vmem:[%s1598_s0 + $0xa8] sm:$0xff]  ;;  %v1031_v29 = vld [vmem:[%s1598_s0 + $0xd8] sm:$0xff] }
   0xc   :  { %1042 = vmatpush.bf16.msra.mxu2 %v1037_v4  ;;  %1043 = vmatpush.bf16.msra.mxu3 %v1037_v4  ;;  %v1011_v30 = vld [vmem:[%s1598_s0 + $0x38] sm:$0xff]  ;;  %v1026_v32 = vld [vmem:[%s1598_s0 + $0xb0] sm:$0xff]  ;;  %v1032_v33 = vld [vmem:[%s1598_s0 + $0xe0] sm:$0xff] }
   0xd   :  { %v1019_v31 = vld [vmem:[%s1598_s0 + $0x78] sm:$0xff]  ;;  %v1033_v37 = vld [vmem:[%s1598_s0 + $0xe8] sm:$0xff]  ;;  %v1034_v49 = vld [vmem:[%s1598_s0 + $0xf0] sm:$0xff] }
   0xe   :  { %v1027_v36 = vld [vmem:[%s1598_s0 + $0xb8] sm:$0xff] }
   0xf   :  { %369 = vmatpush.bf16.msra.mxu0 %v1036_v5  ;;  %1044 = vmatpush.bf16.msra.mxu1 %v1036_v5  ;;  %v1035_v62 = vld [vmem:[%s1598_s0 + $0xf8] sm:$0xff]  ;;  %s1128_s0 = smov [#allocation2]  }
  0x10   :  { %1045 = vmatpush.bf16.msra.mxu2 %v1036_v5  ;;  %1046 = vmatpush.bf16.msra.mxu3 %v1036_v5  ;;  %s791_s30 = sshll.u32 %s1128_s0, 4  ;;  %s792_s30 = int_to_ptr.vmem [resolvable:$true] %s791_s30 }
  0x12   :  { %972 = vmatmul.msk.bf16.vlgmr.msra.gmra.mxu0 %vm261_vm1, %v1004_v6  ;;  %980 = vmatmul.msk.bf16.vlgmr.msra.gmra.mxu1 %vm261_vm1, %v1012_v7 }
  0x13   :  { %988 = vmatmul.msk.bf16.vlgmr.msra.gmra.mxu2 %vm261_vm1, %v1020_v10  ;;  %996 = vmatmul.msk.bf16.vlgmr.msra.gmra.mxu3 %vm261_vm1, %v1028_v17 }
  0x22   :  { %973 = vmatmul.msk.bf16.gmra.mxu0 %vm261_vm1, %v1005_v8  ;;  %981 = vmatmul.msk.bf16.gmra.mxu1 %vm261_vm1, %v1013_v9 }
  0x23   :  { %989 = vmatmul.msk.bf16.gmra.mxu2 %vm261_vm1, %v1021_v13  ;;  %997 = vmatmul.msk.bf16.gmra.mxu3 %vm261_vm1, %v1029_v21 }
  0x32   :  { %974 = vmatmul.msk.bf16.gmra.mxu0 %vm261_vm1, %v1006_v11  ;;  %982 = vmatmul.msk.bf16.gmra.mxu1 %vm261_vm1, %v1014_v12 }
  0x33   :  { %990 = vmatmul.msk.bf16.gmra.mxu2 %vm261_vm1, %v1022_v16  ;;  %998 = vmatmul.msk.bf16.gmra.mxu3 %vm261_vm1, %v1030_v25 }
  0x42   :  { %975 = vmatmul.msk.bf16.gmra.mxu0 %vm261_vm1, %v1007_v14  ;;  %983 = vmatmul.msk.bf16.gmra.mxu1 %vm261_vm1, %v1015_v15 }
  0x43   :  { %991 = vmatmul.msk.bf16.gmra.mxu2 %vm261_vm1, %v1023_v20  ;;  %999 = vmatmul.msk.bf16.gmra.mxu3 %vm261_vm1, %v1031_v29 }
  0x52   :  { %976 = vmatmul.msk.bf16.gmra.mxu0 %vm261_vm1, %v1008_v18  ;;  %984 = vmatmul.msk.bf16.gmra.mxu1 %vm261_vm1, %v1016_v19 }
  0x53   :  { %992 = vmatmul.msk.bf16.gmra.mxu2 %vm261_vm1, %v1024_v24  ;;  %1000 = vmatmul.msk.bf16.gmra.mxu3 %vm261_vm1, %v1032_v33 }
  0x62   :  { %977 = vmatmul.msk.bf16.gmra.mxu0 %vm261_vm1, %v1009_v22  ;;  %985 = vmatmul.msk.bf16.gmra.mxu1 %vm261_vm1, %v1017_v23 }
  0x63   :  { %993 = vmatmul.msk.bf16.gmra.mxu2 %vm261_vm1, %v1025_v28  ;;  %1001 = vmatmul.msk.bf16.gmra.mxu3 %vm261_vm1, %v1033_v37 }
  0x72   :  { %978 = vmatmul.msk.bf16.gmra.mxu0 %vm261_vm1, %v1010_v26  ;;  %986 = vmatmul.msk.bf16.gmra.mxu1 %vm261_vm1, %v1018_v27 }
  0x73   :  { %994 = vmatmul.msk.bf16.gmra.mxu2 %vm261_vm1, %v1026_v32  ;;  %1002 = vmatmul.msk.bf16.gmra.mxu3 %vm261_vm1, %v1034_v49 }
  0x82   :  { %979 = vmatmul.msk.bf16.gmra.mxu0 %vm261_vm1, %v1011_v30  ;;  %987 = vmatmul.msk.bf16.gmra.mxu1 %vm261_vm1, %v1019_v31 }
  0x83   :  { %995 = vmatmul.msk.bf16.gmra.mxu2 %vm261_vm1, %v1027_v36  ;;  %1003 = vmatmul.msk.bf16.gmra.mxu3 %vm261_vm1, %v1035_v62 }
  0x8f   :  { %v371_v34 = vpop.f32.mrf.mxu0  ;;  %v1279_v35 = vpop.f32.mrf.mxu1 }
  0x90   :  { %531 = vst [vmem:[#allocation2] sm:$0xff] %v371_v34  ;;  %v659_v40 = vmul.f32 %v371_v34, %v371_v34 }
  0x91   :  { %547 = vst [vmem:[#allocation2 + $0x80] sm:$0xff] %v1279_v35 }
  0x96   :  { %v1302_v54 = vpop.f32.mrf.mxu2  ;;  %v1336_v8 = vpop.f32.mrf.mxu3 }
  0x97   :  { %v373_v38 = vpop.f32.mrf.mxu0  ;;  %v1290_v39 = vpop.f32.mrf.mxu1  ;;  %563 = vst [vmem:[#allocation2 + $0x100] sm:$0xff] %v1302_v54 }
  0x98   :  { %532 = vst [vmem:[#allocation2 + $0x8] sm:$0xff] %v373_v38  ;;  %v595_v41 = vadd.f32 %v373_v38, %v371_v34  ;;  %v660_v42 = vmul.f32 %v373_v38, %v373_v38 }
  0x99   :  { %548 = vst [vmem:[#allocation2 + $0x88] sm:$0xff] %v1290_v39 }
  0x9a   :  { %v723_v43 = vadd.f32 %v660_v42, %v659_v40  ;;  %579 = vst [vmem:[#allocation2 + $0x180] sm:$0xff] %v1336_v8 }
  0x9e   :  { %v1310_v60 = vpop.f32.mrf.mxu2  ;;  %v1345_v12 = vpop.f32.mrf.mxu3 }
  0x9f   :  { %v376_v44 = vpop.f32.mrf.mxu0  ;;  %v1293_v45 = vpop.f32.mrf.mxu1  ;;  %564 = vst [vmem:[#allocation2 + $0x108] sm:$0xff] %v1310_v60 }
  0xa0   :  { %533 = vst [vmem:[#allocation2 + $0x10] sm:$0xff] %v376_v44  ;;  %v596_v46 = vadd.f32 %v595_v41, %v376_v44  ;;  %v661_v47 = vmul.f32 %v376_v44, %v376_v44 }
  0xa1   :  { %549 = vst [vmem:[#allocation2 + $0x90] sm:$0xff] %v1293_v45 }
  0xa2   :  { %v724_v48 = vadd.f32 %v723_v43, %v661_v47  ;;  %580 = vst [vmem:[#allocation2 + $0x188] sm:$0xff] %v1345_v12 }
  0xa6   :  { %v1322_v1 = vpop.f32.mrf.mxu2  ;;  %v1354_v16 = vpop.f32.mrf.mxu3 }
  0xa7   :  { %v378_v50 = vpop.f32.mrf.mxu0  ;;  %v1300_v51 = vpop.f32.mrf.mxu1  ;;  %565 = vst [vmem:[#allocation2 + $0x110] sm:$0xff] %v1322_v1 }
  0xa8   :  { %534 = vst [vmem:[#allocation2 + $0x18] sm:$0xff] %v378_v50  ;;  %v597_v52 = vadd.f32 %v596_v46, %v378_v50  ;;  %v662_v53 = vmul.f32 %v378_v50, %v378_v50 }
  0xa9   :  { %550 = vst [vmem:[#allocation2 + $0x98] sm:$0xff] %v1300_v51 }
  0xaa   :  { %v725_v55 = vadd.f32 %v724_v48, %v662_v53  ;;  %581 = vst [vmem:[#allocation2 + $0x190] sm:$0xff] %v1354_v16 }
  0xae   :  { %v1328_v4 = vpop.f32.mrf.mxu2  ;;  %v1363_v20 = vpop.f32.mrf.mxu3 }
  0xaf   :  { %v381_v56 = vpop.f32.mrf.mxu0  ;;  %v1306_v57 = vpop.f32.mrf.mxu1  ;;  %566 = vst [vmem:[#allocation2 + $0x118] sm:$0xff] %v1328_v4 }
  0xb0   :  { %535 = vst [vmem:[#allocation2 + $0x20] sm:$0xff] %v381_v56  ;;  %v1308_v58 = vadd.f32 %v597_v52, %v381_v56  ;;  %v663_v59 = vmul.f32 %v381_v56, %v381_v56 }
  0xb1   :  { %551 = vst [vmem:[#allocation2 + $0xa0] sm:$0xff] %v1306_v57 }
  0xb2   :  { %v1313_v61 = vadd.f32 %v725_v55, %v663_v59  ;;  %582 = vst [vmem:[#allocation2 + $0x198] sm:$0xff] %v1363_v20 }
  0xb6   :  { %v1334_v7 = vpop.f32.mrf.mxu2  ;;  %v1372_v24 = vpop.f32.mrf.mxu3 }
  0xb7   :  { %v383_v63 = vpop.f32.mrf.mxu0  ;;  %v1320_v0 = vpop.f32.mrf.mxu1  ;;  %567 = vst [vmem:[#allocation2 + $0x120] sm:$0xff] %v1334_v7 }
  0xb8   :  { %536 = vst [vmem:[#allocation2 + $0x28] sm:$0xff] %v383_v63  ;;  %v664_v29 = vmul.f32 %v383_v63, %v383_v63  ;;  %v599_v30 = vadd.f32 %v1308_v58, %v383_v63 }
  0xb9   :  { %552 = vst [vmem:[#allocation2 + $0xa8] sm:$0xff] %v1320_v0 }
  0xba   :  { %583 = vst [vmem:[#allocation2 + $0x1a0] sm:$0xff] %v1372_v24  ;;  %v727_v32 = vadd.f32 %v1313_v61, %v664_v29 }
  0xbe   :  { %v1343_v11 = vpop.f32.mrf.mxu2  ;;  %v1381_v28 = vpop.f32.mrf.mxu3 }
  0xbf   :  { %v386_v2 = vpop.f32.mrf.mxu0  ;;  %v1326_v3 = vpop.f32.mrf.mxu1  ;;  %568 = vst [vmem:[#allocation2 + $0x128] sm:$0xff] %v1343_v11 }
  0xc0   :  { %537 = vst [vmem:[#allocation2 + $0x30] sm:$0xff] %v386_v2  ;;  %v665_v31 = vmul.f32 %v386_v2, %v386_v2  ;;  %v600_v33 = vadd.f32 %v599_v30, %v386_v2 }
  0xc1   :  { %553 = vst [vmem:[#allocation2 + $0xb0] sm:$0xff] %v1326_v3 }
  0xc2   :  { %584 = vst [vmem:[#allocation2 + $0x1a8] sm:$0xff] %v1381_v28  ;;  %v728_v38 = vadd.f32 %v727_v32, %v665_v31 }
  0xc6   :  { %v1352_v15 = vpop.f32.mrf.mxu2  ;;  %v1392_v43 = vpop.f32.mrf.mxu3 }
  0xc7   :  { %v388_v5 = vpop.f32.mrf.mxu0  ;;  %v1332_v6 = vpop.f32.mrf.mxu1  ;;  %569 = vst [vmem:[#allocation2 + $0x130] sm:$0xff] %v1352_v15 }
  0xc8   :  { %538 = vst [vmem:[#allocation2 + $0x38] sm:$0xff] %v388_v5  ;;  %v666_v34 = vmul.f32 %v388_v5, %v388_v5  ;;  %v601_v40 = vadd.f32 %v600_v33, %v388_v5 }
  0xc9   :  { %554 = vst [vmem:[#allocation2 + $0xb8] sm:$0xff] %v1332_v6 }
  0xca   :  { %v729_v44 = vadd.f32 %v728_v38, %v666_v34  ;;  %585 = vst [vmem:[#allocation2 + $0x1b0] sm:$0xff] %v1392_v43 }
  0xce   :  { %v1361_v19 = vpop.f32.mrf.mxu2  ;;  %v1401_v2 = vpop.f32.mrf.mxu3 }
  0xcf   :  { %v391_v9 = vpop.f32.mrf.mxu0  ;;  %v1341_v10 = vpop.f32.mrf.mxu1  ;;  %570 = vst [vmem:[#allocation2 + $0x138] sm:$0xff] %v1361_v19 }
  0xd0   :  { %539 = vst [vmem:[#allocation2 + $0x40] sm:$0xff] %v391_v9  ;;  %v667_v41 = vmul.f32 %v391_v9, %v391_v9  ;;  %v602_v46 = vadd.f32 %v601_v40, %v391_v9 }
  0xd1   :  { %555 = vst [vmem:[#allocation2 + $0xc0] sm:$0xff] %v1341_v10 }
  0xd2   :  { %v730_v48 = vadd.f32 %v729_v44, %v667_v41  ;;  %586 = vst [vmem:[#allocation2 + $0x1b8] sm:$0xff] %v1401_v2  ;;  %v675_v44 = vmul.f32 %v1279_v35, %v1279_v35 }
  0xd6   :  { %v1370_v23 = vpop.f32.mrf.mxu2 }
  0xd7   :  { %v393_v13 = vpop.f32.mrf.mxu0  ;;  %v1350_v14 = vpop.f32.mrf.mxu1  ;;  %571 = vst [vmem:[#allocation2 + $0x140] sm:$0xff] %v1370_v23 }
  0xd8   :  { %540 = vst [vmem:[#allocation2 + $0x48] sm:$0xff] %v393_v13  ;;  %v668_v47 = vmul.f32 %v393_v13, %v393_v13  ;;  %v603_v49 = vadd.f32 %v602_v46, %v393_v13 }
  0xd9   :  { %556 = vst [vmem:[#allocation2 + $0xc8] sm:$0xff] %v1350_v14 }
  0xda   :  { %v731_v52 = vadd.f32 %v730_v48, %v668_v47  ;;  %v676_v47 = vmul.f32 %v1290_v39, %v1290_v39 }
  0xde   :  { %v1379_v27 = vpop.f32.mrf.mxu2 }
  0xdf   :  { %v396_v17 = vpop.f32.mrf.mxu0  ;;  %v1359_v18 = vpop.f32.mrf.mxu1  ;;  %572 = vst [vmem:[#allocation2 + $0x148] sm:$0xff] %v1379_v27 }
  0xe0   :  { %541 = vst [vmem:[#allocation2 + $0x50] sm:$0xff] %v396_v17  ;;  %v669_v50 = vmul.f32 %v396_v17, %v396_v17  ;;  %v604_v53 = vadd.f32 %v603_v49, %v396_v17 }
  0xe1   :  { %557 = vst [vmem:[#allocation2 + $0xd0] sm:$0xff] %v1359_v18 }
  0xe2   :  { %v732_v59 = vadd.f32 %v731_v52, %v669_v50  ;;  %v677_v50 = vmul.f32 %v1293_v45, %v1293_v45 }
  0xe6   :  { %v1390_v42 = vpop.f32.mrf.mxu2 }
  0xe7   :  { %v398_v21 = vpop.f32.mrf.mxu0  ;;  %v1368_v22 = vpop.f32.mrf.mxu1  ;;  %573 = vst [vmem:[#allocation2 + $0x150] sm:$0xff] %v1390_v42 }
  0xe8   :  { %542 = vst [vmem:[#allocation2 + $0x58] sm:$0xff] %v398_v21  ;;  %v670_v55 = vmul.f32 %v398_v21, %v398_v21  ;;  %v605_v61 = vadd.f32 %v604_v53, %v398_v21 }
  0xe9   :  { %558 = vst [vmem:[#allocation2 + $0xd8] sm:$0xff] %v1368_v22 }
  0xea   :  { %v733_v5 = vadd.f32 %v732_v59, %v670_v55 }
  0xee   :  { %v1399_v63 = vpop.f32.mrf.mxu2 }
  0xef   :  { %v401_v25 = vpop.f32.mrf.mxu0  ;;  %v1377_v26 = vpop.f32.mrf.mxu1  ;;  %574 = vst [vmem:[#allocation2 + $0x158] sm:$0xff] %v1399_v63 }
  0xf0   :  { %543 = vst [vmem:[#allocation2 + $0x60] sm:$0xff] %v401_v25  ;;  %v671_v62 = vmul.f32 %v401_v25, %v401_v25  ;;  %v606_v9 = vadd.f32 %v605_v61, %v401_v25  ;;  %v1410_v25 = vpop.f32.mrf.mxu3 }
  0xf1   :  { %559 = vst [vmem:[#allocation2 + $0xe0] sm:$0xff] %v1377_v26 }
  0xf2   :  { %v734_v17 = vadd.f32 %v733_v5, %v671_v62  ;;  %587 = vst [vmem:[#allocation2 + $0x1c0] sm:$0xff] %v1410_v25 }
  0xf6   :  { %v1408_v41 = vpop.f32.mrf.mxu2 }
  0xf7   :  { %v403_v36 = vpop.f32.mrf.mxu0  ;;  %v1388_v37 = vpop.f32.mrf.mxu1  ;;  %575 = vst [vmem:[#allocation2 + $0x160] sm:$0xff] %v1408_v41 }
  0xf8   :  { %544 = vst [vmem:[#allocation2 + $0x68] sm:$0xff] %v403_v36  ;;  %v672_v13 = vmul.f32 %v403_v36, %v403_v36  ;;  %v607_v29 = vadd.f32 %v606_v9, %v403_v36  ;;  %v1429_v61 = vpop.f32.mrf.mxu3 }
  0xf9   :  { %560 = vst [vmem:[#allocation2 + $0xe8] sm:$0xff] %v1388_v37 }
  0xfa   :  { %v735_v31 = vadd.f32 %v734_v17, %v672_v13  ;;  %588 = vst [vmem:[#allocation2 + $0x1c8] sm:$0xff] %v1429_v61  ;;  %v681_v13 = vmul.f32 %v1326_v3, %v1326_v3 }
  0xfe   :  { %v1427_v59 = vpop.f32.mrf.mxu2 }
  0xff   :  { %v406_v56 = vpop.f32.mrf.mxu0  ;;  %v1397_v58 = vpop.f32.mrf.mxu1  ;;  %576 = vst [vmem:[#allocation2 + $0x168] sm:$0xff] %v1427_v59 }
 0x100   :  { %545 = vst [vmem:[#allocation2 + $0x70] sm:$0xff] %v406_v56  ;;  %v673_v30 = vmul.f32 %v406_v56, %v406_v56  ;;  %v608_v21 = vadd.f32 %v607_v29, %v406_v56 }
 0x101   :  { %561 = vst [vmem:[#allocation2 + $0xf0] sm:$0xff] %v1397_v58 }
 0x102   :  { %v736_v34 = vadd.f32 %v735_v31, %v673_v30  ;;  %v682_v30 = vmul.f32 %v1332_v6, %v1332_v6 }
 0x107   :  { %v408_v32 = vpop.f32.mrf.mxu0  ;;  %v1406_v33 = vpop.f32.mrf.mxu1 }
 0x108   :  { %546 = vst [vmem:[#allocation2 + $0x78] sm:$0xff] %v408_v32  ;;  %v609_v38 = vadd.f32 %v608_v21, %v408_v32  ;;  %v674_v40 = vmul.f32 %v408_v32, %v408_v32  ;;  %v1445_v21 = vpop.f32.mrf.mxu2  ;;  %v1447_v32 = vpop.f32.mrf.mxu3 }
 0x109   :  { %562 = vst [vmem:[#allocation2 + $0xf8] sm:$0xff] %v1406_v33 }
 0x10a   :  { %v610_v36 = vadd.f32 %v609_v38, %v1279_v35  ;;  %v737_v46 = vadd.f32 %v736_v34, %v674_v40  ;;  %v678_v35 = vmul.f32 %v1300_v51, %v1300_v51  ;;  %577 = vst [vmem:[#allocation2 + $0x170] sm:$0xff] %v1445_v21 }
 0x10b   :  { %589 = vst [vmem:[#allocation2 + $0x1d0] sm:$0xff] %v1447_v32 }
 0x10c   :  { %v611_v48 = vadd.f32 %v610_v36, %v1290_v39  ;;  %v738_v49 = vadd.f32 %v737_v46, %v675_v44  ;;  %v679_v39 = vmul.f32 %v1306_v57, %v1306_v57  ;;  %v685_v44 = vmul.f32 %v1359_v18, %v1359_v18 }
 0x10e   :  { %v612_v52 = vadd.f32 %v611_v48, %v1293_v45  ;;  %v739_v53 = vadd.f32 %v738_v49, %v676_v47  ;;  %v680_v45 = vmul.f32 %v1320_v0, %v1320_v0  ;;  %v686_v47 = vmul.f32 %v1368_v22, %v1368_v22 }
 0x110   :  { %v613_v55 = vadd.f32 %v612_v52, %v1300_v51  ;;  %v740_v56 = vadd.f32 %v739_v53, %v677_v50  ;;  %v1463_v49 = vpop.f32.mrf.mxu2  ;;  %v1465_v50 = vpop.f32.mrf.mxu3  ;;  %v687_v52 = vmul.f32 %v1377_v26, %v1377_v26 }
 0x111   :  { %578 = vst [vmem:[#allocation2 + $0x178] sm:$0xff] %v1463_v49 }
 0x112   :  { %v614_v62 = vadd.f32 %v613_v55, %v1306_v57  ;;  %v741_v5 = vadd.f32 %v740_v56, %v678_v35  ;;  %590 = vst [vmem:[#allocation2 + $0x1d8] sm:$0xff] %v1465_v50 }
 0x114   :  { %v615_v51 = vadd.f32 %v614_v62, %v1320_v0  ;;  %v742_v9 = vadd.f32 %v741_v5, %v679_v39  ;;  %v683_v0 = vmul.f32 %v1341_v10, %v1341_v10  ;;  %v689_v39 = vmul.f32 %v1397_v58, %v1397_v58 }
 0x116   :  { %v743_v17 = vadd.f32 %v742_v9, %v680_v45  ;;  %v616_v29 = vadd.f32 %v615_v51, %v1326_v3  ;;  %v684_v3 = vmul.f32 %v1350_v14, %v1350_v14  ;;  %v691_v51 = vmul.f32 %v1302_v54, %v1302_v54 }
 0x118   :  { %v617_v57 = vadd.f32 %v616_v29, %v1332_v6  ;;  %v744_v31 = vadd.f32 %v743_v17, %v681_v13  ;;  %v1481_v45 = vpop.f32.mrf.mxu3  ;;  %v692_v13 = vmul.f32 %v1310_v60, %v1310_v60  ;;  %v693_v29 = vmul.f32 %v1322_v1, %v1322_v1 }
 0x119   :  { %591 = vst [vmem:[#allocation2 + $0x1e0] sm:$0xff] %v1481_v45 }
 0x11a   :  { %v618_v34 = vadd.f32 %v617_v57, %v1341_v10  ;;  %v745_v38 = vadd.f32 %v744_v31, %v682_v30  ;;  %v694_v57 = vmul.f32 %v1328_v4, %v1328_v4 }
 0x11c   :  { %v619_v6 = vadd.f32 %v618_v34, %v1350_v14  ;;  %v746_v40 = vadd.f32 %v745_v38, %v683_v0 }
 0x11e   :  { %v620_v36 = vadd.f32 %v619_v6, %v1359_v18  ;;  %v747_v46 = vadd.f32 %v746_v40, %v684_v3 }
 0x120   :  { %v621_v10 = vadd.f32 %v620_v36, %v1368_v22  ;;  %v748_v48 = vadd.f32 %v747_v46, %v685_v44  ;;  %v688_v22 = vmul.f32 %v1388_v37, %v1388_v37  ;;  %v698_v36 = vmul.f32 %v1361_v19, %v1361_v19 }
 0x122   :  { %v622_v14 = vadd.f32 %v621_v10, %v1377_v26  ;;  %v749_v53 = vadd.f32 %v748_v48, %v686_v47  ;;  %v690_v26 = vmul.f32 %v1406_v33, %v1406_v33 }
 0x124   :  { %v750_v18 = vadd.f32 %v749_v53, %v687_v52  ;;  %v623_v35 = vadd.f32 %v622_v14, %v1388_v37  ;;  %v701_v52 = vmul.f32 %v1390_v42, %v1390_v42 }
 0x126   :  { %v751_v55 = vadd.f32 %v750_v18, %v688_v22  ;;  %v624_v56 = vadd.f32 %v623_v35, %v1397_v58  ;;  %v702_v35 = vmul.f32 %v1399_v63, %v1399_v63 }
 0x128   :  { %v752_v62 = vadd.f32 %v751_v55, %v689_v39  ;;  %v625_v5 = vadd.f32 %v624_v56, %v1406_v33  ;;  %v703_v39 = vmul.f32 %v1408_v41, %v1408_v41 }
 0x12a   :  { %v626_v37 = vadd.f32 %v625_v5, %v1302_v54  ;;  %v753_v9 = vadd.f32 %v752_v62, %v690_v26  ;;  %v1496_v54 = vpop.f32.mrf.mxu3 }
 0x12b   :  { %592 = vst [vmem:[#allocation2 + $0x1e8] sm:$0xff] %v1496_v54 }
 0x12c   :  { %v627_v58 = vadd.f32 %v626_v37, %v1310_v60  ;;  %v754_v17 = vadd.f32 %v753_v9, %v691_v51  ;;  %v695_v60 = vmul.f32 %v1334_v7, %v1334_v7  ;;  %v705_v51 = vmul.f32 %v1445_v21, %v1445_v21 }
 0x12e   :  { %v628_v33 = vadd.f32 %v627_v58, %v1322_v1  ;;  %v755_v30 = vadd.f32 %v754_v17, %v692_v13  ;;  %v696_v1 = vmul.f32 %v1343_v11, %v1343_v11  ;;  %v707_v13 = vmul.f32 %v1336_v8, %v1336_v8 }
 0x130   :  { %v629_v31 = vadd.f32 %v628_v33, %v1328_v4  ;;  %v756_v0 = vadd.f32 %v755_v30, %v693_v29  ;;  %v697_v4 = vmul.f32 %v1352_v15, %v1352_v15 }
 0x132   :  { %v630_v34 = vadd.f32 %v629_v31, %v1334_v7  ;;  %v757_v38 = vadd.f32 %v756_v0, %v694_v57  ;;  %v1511_v7 = vpop.f32.mrf.mxu3 }
 0x133   :  { %593 = vst [vmem:[#allocation2 + $0x1f0] sm:$0xff] %v1511_v7 }
 0x134   :  { %v631_v3 = vadd.f32 %v630_v34, %v1343_v11  ;;  %v758_v6 = vadd.f32 %v757_v38, %v695_v60  ;;  %v699_v11 = vmul.f32 %v1370_v23, %v1370_v23 }
 0x136   :  { %v759_v40 = vadd.f32 %v758_v6, %v696_v1  ;;  %v632_v44 = vadd.f32 %v631_v3, %v1352_v15  ;;  %v700_v15 = vmul.f32 %v1379_v27, %v1379_v27 }
 0x138   :  { %v633_v46 = vadd.f32 %v632_v44, %v1361_v19  ;;  %v760_v47 = vadd.f32 %v759_v40, %v697_v4 }
 0x13a   :  { %v634_v10 = vadd.f32 %v633_v46, %v1370_v23  ;;  %v761_v48 = vadd.f32 %v760_v47, %v698_v36  ;;  %v1529_v55 = vpop.f32.mrf.mxu3 }
 0x13b   :  { %594 = vst [vmem:[#allocation2 + $0x1f8] sm:$0xff] %v1529_v55 }
 0x13c   :  { %v635_v19 = vadd.f32 %v634_v10, %v1379_v27  ;;  %v762_v14 = vadd.f32 %v761_v48, %v699_v11  ;;  %799 = dma.vmem_to_hbm [thread:$0]  %s792_s30, 8192, %s794_s7, [#allocation3], %s1129_s2, %s1129_s2, %s1130_s8   ;;  %v718_v48 = vmul.f32 %v1465_v50, %v1465_v50 }
 0x13e   :  { %v636_v53 = vadd.f32 %v635_v19, %v1390_v42  ;;  %v763_v18 = vadd.f32 %v762_v14, %v700_v15  ;;  %v719_v14 = vmul.f32 %v1481_v45, %v1481_v45 }
 0x140   :  { %v637_v23 = vadd.f32 %v636_v53, %v1399_v63  ;;  %v764_v22 = vadd.f32 %v763_v18, %v701_v52  ;;  %v704_v63 = vmul.f32 %v1427_v59, %v1427_v59  ;;  %v720_v53 = vmul.f32 %v1496_v54, %v1496_v54 }
 0x141   :  { %v721_v18 = vmul.f32 %v1511_v7, %v1511_v7 }
 0x142   :  { %v765_v27 = vadd.f32 %v764_v22, %v702_v35  ;;  %v638_v56 = vadd.f32 %v637_v23, %v1408_v41  ;;  %v706_v41 = vmul.f32 %v1463_v49, %v1463_v49  ;;  %v722_v23 = vmul.f32 %v1529_v55, %v1529_v55 }
 0x144   :  { %v766_v42 = vadd.f32 %v765_v27, %v703_v39  ;;  %v639_v62 = vadd.f32 %v638_v56, %v1427_v59  ;;  %v708_v59 = vmul.f32 %v1345_v12, %v1345_v12 }
 0x146   :  { %v767_v5 = vadd.f32 %v766_v42, %v704_v63  ;;  %v640_v26 = vadd.f32 %v639_v62, %v1445_v21  ;;  %v709_v21 = vmul.f32 %v1354_v16, %v1354_v16 }
 0x148   :  { %v768_v37 = vadd.f32 %v767_v5, %v705_v51  ;;  %v641_v9 = vadd.f32 %v640_v26, %v1463_v49  ;;  %v710_v49 = vmul.f32 %v1363_v20, %v1363_v20 }
 0x14a   :  { %v642_v58 = vadd.f32 %v641_v9, %v1336_v8  ;;  %v769_v17 = vadd.f32 %v768_v37, %v706_v41  ;;  %v711_v8 = vmul.f32 %v1372_v24, %v1372_v24 }
 0x14c   :  { %v643_v29 = vadd.f32 %v642_v58, %v1345_v12  ;;  %v770_v33 = vadd.f32 %v769_v17, %v707_v13  ;;  %v712_v12 = vmul.f32 %v1381_v28, %v1381_v28 }
 0x14e   :  { %v644_v30 = vadd.f32 %v643_v29, %v1354_v16  ;;  %v771_v57 = vadd.f32 %v770_v33, %v708_v59  ;;  %v713_v16 = vmul.f32 %v1392_v43, %v1392_v43 }
 0x150   :  { %v645_v31 = vadd.f32 %v644_v30, %v1363_v20  ;;  %v772_v0 = vadd.f32 %v771_v57, %v709_v21  ;;  %v714_v20 = vmul.f32 %v1401_v2, %v1401_v2 }
 0x152   :  { %v646_v60 = vadd.f32 %v645_v31, %v1372_v24  ;;  %v773_v34 = vadd.f32 %v772_v0, %v710_v49  ;;  %v715_v24 = vmul.f32 %v1410_v25, %v1410_v25 }
 0x154   :  { %v647_v38 = vadd.f32 %v646_v60, %v1381_v28  ;;  %v774_v1 = vadd.f32 %v773_v34, %v711_v8  ;;  %v716_v28 = vmul.f32 %v1429_v61, %v1429_v61 }
 0x156   :  { %v775_v3 = vadd.f32 %v774_v1, %v712_v12  ;;  %v648_v6 = vadd.f32 %v647_v38, %v1392_v43  ;;  %v717_v43 = vmul.f32 %v1447_v32, %v1447_v32 }
 0x158   :  { %v649_v4 = vadd.f32 %v648_v6, %v1401_v2  ;;  %v776_v40 = vadd.f32 %v775_v3, %v713_v16 }
 0x15a   :  { %v650_v44 = vadd.f32 %v649_v4, %v1410_v25  ;;  %v777_v36 = vadd.f32 %v776_v40, %v714_v20 }
 0x15c   :  { %v651_v46 = vadd.f32 %v650_v44, %v1429_v61  ;;  %v778_v47 = vadd.f32 %v777_v36, %v715_v24 }
 0x15e   :  { %v652_v11 = vadd.f32 %v651_v46, %v1447_v32  ;;  %v779_v10 = vadd.f32 %v778_v47, %v716_v28 }
 0x160   :  { %v653_v2 = vadd.f32 %v652_v11, %v1465_v50  ;;  %v780_v15 = vadd.f32 %v779_v10, %v717_v43 }
 0x162   :  { %v781_v25 = vadd.f32 %v780_v15, %v718_v48  ;;  %v654_v19 = vadd.f32 %v653_v2, %v1481_v45 }
 0x164   :  { %v782_v61 = vadd.f32 %v781_v25, %v719_v14  ;;  %v655_v52 = vadd.f32 %v654_v19, %v1496_v54 }
 0x166   :  { %v783_v32 = vadd.f32 %v782_v61, %v720_v53  ;;  %v656_v50 = vadd.f32 %v655_v52, %v1511_v7 }
 0x168   :  { %v784_v45 = vadd.f32 %v783_v32, %v721_v18  ;;  %v657_v54 = vadd.f32 %v656_v50, %v1529_v55 }
 0x16a   :  { %658 = vst [vmem:[#allocation4] sm:$0xff] %v657_v54  ;;  %v785_v35 = vadd.f32 %v784_v45, %v722_v23 }
 0x16b   :  { %810 = dma.vmem_to_hbm [thread:$0]  %s806_s10, 128, %s808_s13, [#allocation5]  }
 0x16c   :  { %786 = vst [vmem:[#allocation6] sm:$0xff] %v785_v35 }
 0x16d   :  { %821 = dma.vmem_to_hbm [thread:$0]  %s817_s15, 128, %s819_s18, [#allocation5]  }
 0x16e   :  { %1124 = dma.done.wait [#allocation3], 8192  }
 0x16f   :  { %1125 = vsyncadd [#allocation3], 4294959104 }
 0x170   :  { %1126 = dma.done.wait [#allocation5], 256  }
 0x171   :  { %1127 = vsyncadd [#allocation5], 4294967040 }
 0x172   :  { %834 = vsyncpa [#allocation3], 1 }
 0x173   :  { %835 = vsyncpa [#allocation5], 1 }

</bundles_post_ra>
